<compile_context>
chip_gen: v6e
topology: v6e:2x2x1
jax: 0.10.0
libtpu: 0.0.40
codegen_flags: <defaults>
</compile_context>

<pallas_src>
import jax
import jax.numpy as jnp
from jax.experimental import pallas as pl
from jax.experimental.pallas import tpu as pltpu


def static_embedding_kernel(td_ref, o0_ref, o1_ref, o2_ref):
    # Forward semantics: ignore td entirely, emit (0, 0, 0).
    # td_ref is a raw HBM ref (pl.ANY) kept only for signature fidelity; it is
    # never read, so no DMA / VMEM buffer is created for it.
    del td_ref
    o0_ref[0] = jnp.int32(0)
    o1_ref[0] = jnp.int32(0)
    o2_ref[0] = jnp.int32(0)


def static_embedding_forward(td):
    """Pallas equivalent of StaticEmbedding().forward(td) -> (0, 0, 0)."""
    z0, z1, z2 = pl.pallas_call(
        static_embedding_kernel,
        out_shape=(
            jax.ShapeDtypeStruct((1,), jnp.int32),
            jax.ShapeDtypeStruct((1,), jnp.int32),
            jax.ShapeDtypeStruct((1,), jnp.int32),
        ),
        # td: unused -> leave it in HBM, no auto-DMA, no VMEM residency.
        in_specs=[pl.BlockSpec(memory_space=pl.ANY)],
        # three scalar zeros live in SMEM (12 bytes total of output).
        out_specs=(
            pl.BlockSpec(memory_space=pltpu.SMEM),
            pl.BlockSpec(memory_space=pltpu.SMEM),
            pl.BlockSpec(memory_space=pltpu.SMEM),
        ),
    )(td)
    # Return as a 3-tuple, matching the torch module's (0, 0, 0).
    return (z0, z1, z2)


if __name__ == "__main__":
    key = jax.random.PRNGKey(0)
    # Small NCHW-like input; StaticEmbedding ignores its argument, but we keep
    # the call signature faithful.
    td = jax.random.normal(key, (2, 4, 16, 16), dtype=jnp.float32)

    out = static_embedding_forward(td)
    out = jax.block_until_ready(out)

    assert len(out) == 3
    assert all(int(o[0]) == 0 for o in out)
    print("KERNEL_OK")
</pallas_src>

<mosaic_0001>
module attributes {stable_mosaic.version = 11 : i64} {
  func.func @static_embedding_kernel(%arg0: memref<2x4x16x16xf32, #tpu.memory_space<any>>, %arg1: memref<1xi32, #tpu.memory_space<smem>>, %arg2: memref<1xi32, #tpu.memory_space<smem>>, %arg3: memref<1xi32, #tpu.memory_space<smem>>) attributes {dimension_semantics = [], scalar_prefetch = 0 : i64, scratch_operands = 0 : i64, tpu.core_type = #tpu.core_type<tc>} {
    %c0_i32 = arith.constant 0 : i32
    %c0 = arith.constant 0 : index
    %0 = memref.load %arg1[%c0] : memref<1xi32, #tpu.memory_space<smem>>
    memref.store %c0_i32, %arg1[%c0] : memref<1xi32, #tpu.memory_space<smem>>
    %c0_i32_0 = arith.constant 0 : i32
    %c0_1 = arith.constant 0 : index
    %1 = memref.load %arg2[%c0_1] : memref<1xi32, #tpu.memory_space<smem>>
    memref.store %c0_i32_0, %arg2[%c0_1] : memref<1xi32, #tpu.memory_space<smem>>
    %c0_i32_2 = arith.constant 0 : i32
    %c0_3 = arith.constant 0 : index
    %2 = memref.load %arg3[%c0_3] : memref<1xi32, #tpu.memory_space<smem>>
    memref.store %c0_i32_2, %arg3[%c0_3] : memref<1xi32, #tpu.memory_space<smem>>
    return
  }
}

</mosaic_0001>

<bundles_post_ra>
// kernel: tpu_custom_call.1
= control target key start
LH: loop header
LB: loop body
LE: loop exit
PB: predicated region body
PF: predicated region fallthrough
CT: control target
= control target key end

     0   :  { %9 = vsyncpa [#allocation3], 0  ;;  %s118_s0 = inlined_call_operand.hbm [shape: f32[2,4,16,16], index: 0, kind: input, shape index: {}]   ;;  %s119_s1 = inlined_call_operand.hbm [shape: s32[1], index: 1, kind: output, shape index: {0}]   ;;  %s120_s2 = inlined_call_operand.hbm [shape: s32[1], index: 2, kind: output, shape index: {1}]   ;;  %s121_s3 = inlined_call_operand.hbm [shape: s32[1], index: 3, kind: output, shape index: {2}]  }
   0x1   :  { %10 = vsyncpa [#allocation5], 0  ;;  %s85_s12 = smov 0   ;;  %s86_s13 = smov [#allocation4]  }
   0x2   :  { %14 = sst [smem:[#allocation4]] %s85_s12  ;;  %s87_s0 = smov [#allocation2]  }
   0x3   :  { %32 = dma.smem_to_hbm %s86_s13, 16, %s120_s2, [#allocation5]  }
   0x4   :  { %12 = sst [smem:[#allocation2]] %s85_s12  ;;  %s88_s18 = smov [#allocation6]  }
   0x5   :  { %24 = dma.smem_to_hbm %s87_s0, 16, %s119_s1, [#allocation3]  }
   0x6   :  { %16 = sst [smem:[#allocation6]] %s85_s12 }
   0x7   :  { %40 = dma.smem_to_hbm %s88_s18, 16, %s121_s3, [#allocation5]  }
   0x8   :  { %81 = dma.done.wait [#allocation3], 16  }
   0x9   :  { %82 = vsyncadd [#allocation3], 4294967280 }
   0xa   :  { %83 = dma.done.wait [#allocation5], 32  }
   0xb   :  { %84 = vsyncadd [#allocation5], 4294967264 }
   0xc   :  { %50 = sfence }
   0xd   :  { %51 = vsyncpa [#allocation3], 1 }
   0xe   :  { %52 = vsyncpa [#allocation5], 1 }

</bundles_post_ra>
